<compile_context>
chip_gen: v5e
topology: v5e:2x2
jax: 0.10.0
libtpu: 0.0.40
codegen_flags: <defaults>
</compile_context>

<pallas_src>
import functools

import jax
import jax.numpy as jnp
from jax.experimental import pallas as pl
from jax.experimental.pallas import tpu as pltpu


def _sublane_multiple(dtype):
    # f32 -> 8, bf16 -> 16, int8 -> 32 (sub-32-bit dtypes pack along sublanes).
    return 32 // jnp.dtype(dtype).itemsize


def _pick_batch_tile(B, per_batch_bytes, budget=512 * 1024):
    """Largest divisor of B whose block stays under the byte budget."""
    bt = 1
    for cand in range(1, B + 1):
        if B % cand == 0 and cand * per_batch_bytes <= budget:
            bt = cand
    return bt


# ----------------------------------------------------------------------------
# map_type = 1 : contiguous block chunking
# ----------------------------------------------------------------------------
def _map1_kernel(x_ref, o_ref, *, s2, Hc, Wc, JL, lane_dense):
    # x_ref: (Bt, Cc, JL*Hc, W)
    # o_ref: (Bt, JL, s2, Cc, 1, Hc*Wc)  if lane_dense
    #        (Bt, JL, s2, Cc, Hc, Wc)    otherwise
    for j in range(JL):
        for k in range(s2):
            if not lane_dense:
                o_ref[:, j, k, :, :, :] = x_ref[:, :,
                                                j * Hc:(j + 1) * Hc,
                                                k * Wc:(k + 1) * Wc]
            else:
                for h in range(Hc):
                    row = x_ref[:, :, pl.ds(j * Hc + h, 1), :]        # (Bt,Cc,1,W)
                    o_ref[:, j, k, :, :, pl.ds(h * Wc, Wc)] = (
                        row[:, :, :, k * Wc:(k + 1) * Wc])            # (Bt,Cc,1,Wc)


def _forward_map1(x, split):
    B, C, H, W = x.shape
    s0, s1, s2 = split
    Cc, Hc, Wc = C // s0, H // s1, W // s2
    itemsize = jnp.dtype(x.dtype).itemsize
    sub = _sublane_multiple(x.dtype)

    # Split H through the grid only when the block keeps the sublane dim
    # aligned; otherwise keep full H in the block and loop j in the kernel.
    if s1 == 1 or Hc % sub == 0:
        JG, JL = s1, 1
    else:
        JG, JL = 1, s1

    # Lane-dense output layout when Wc alone is narrower than 128 lanes; cap
    # the unroll so compile time stays bounded.
    lane_dense = (Wc % 128 != 0) and (JL * s2 * Hc <= 1024)

    per_batch_bytes = Cc * (JL * Hc) * W * itemsize
    Bt = _pick_batch_tile(B, per_batch_bytes)
    grid = (B // Bt, s0, JG)

    in_spec = pl.BlockSpec((Bt, Cc, JL * Hc, W), lambda b, i, j: (b, i, j, 0))
    if lane_dense:
        out_shape = jax.ShapeDtypeStruct((B, s0, s1, s2, Cc, 1, Hc * Wc), x.dtype)
        out_spec = pl.BlockSpec((Bt, None, JL, s2, Cc, 1, Hc * Wc),
                                lambda b, i, j: (b, i, j, 0, 0, 0, 0))
    else:
        out_shape = jax.ShapeDtypeStruct((B, s0, s1, s2, Cc, Hc, Wc), x.dtype)
        out_spec = pl.BlockSpec((Bt, None, JL, s2, Cc, Hc, Wc),
                                lambda b, i, j: (b, i, j, 0, 0, 0, 0))

    kernel = functools.partial(_map1_kernel, s2=s2, Hc=Hc, Wc=Wc, JL=JL,
                               lane_dense=lane_dense)
    out = pl.pallas_call(
        kernel,
        out_shape=out_shape,
        grid=grid,
        in_specs=[in_spec],
        out_specs=out_spec,
        compiler_params=pltpu.CompilerParams(
            dimension_semantics=("parallel", "parallel", "parallel"),
            vmem_limit_bytes=32 * 1024 * 1024),
        cost_estimate=pl.CostEstimate(
            flops=0, transcendentals=0,
            bytes_accessed=2 * x.size * itemsize),
    )(x)
    # Free: trailing dims are contiguous (row-major identical layouts).
    return out.reshape(B, s0, s1, s2, Cc, Hc, Wc)


# ----------------------------------------------------------------------------
# map_type = 2 : strided (interleaved) chunking
# ----------------------------------------------------------------------------
def _map2_kernel(x_ref, o_ref, *, s1, s2, W, Wc):
    # x_ref: (Bt, Cc, Hc, s1*W)  -- the stride-s0 (C) and stride-s1 (H) chunk
    #                               selection was already done by the BlockSpec
    #                               DMA on a free 5-D reshape of x.
    # o_ref: (Bt, s1, s2, Cc, Hc, Wc)
    # TODO(synk): replace the single-lane copies below with a strided lane read
    # (pl.ds(..., stride=s2)) / XLU de-interleave once that lowering is
    # guaranteed; this version keeps only plain static slices.
    for j in range(s1):
        for w in range(Wc):
            grp = x_ref[:, :, :, pl.ds(j * W + w * s2, s2)]      # (Bt,Cc,Hc,s2)
            for k in range(s2):
                o_ref[:, j, k, :, :, pl.ds(w, 1)] = grp[:, :, :, k:k + 1]


def _forward_map2(x, split):
    B, C, H, W = x.shape
    s0, s1, s2 = split
    Cc, Hc, Wc = C // s0, H // s1, W // s2
    itemsize = jnp.dtype(x.dtype).itemsize

    # Free reshape: C -> (Cc, s0) and H -> (Hc, s1), merging the s1 part into
    # the lane dim.  The strided chunk selection over C and H then becomes a
    # plain BlockSpec block index (performed by the DMA engine).
    xr = x.reshape(B, Cc, s0, Hc, s1 * W)

    per_batch_bytes = Cc * Hc * s1 * W * itemsize
    Bt = _pick_batch_tile(B, per_batch_bytes)
    grid = (B // Bt, s0)

    in_spec = pl.BlockSpec((Bt, Cc, None, Hc, s1 * W),
                           lambda b, i: (b, 0, i, 0, 0))
    out_spec = pl.BlockSpec((Bt, None, s1, s2, Cc, Hc, Wc),
                            lambda b, i: (b, i, 0, 0, 0, 0, 0))
    kernel = functools.partial(_map2_kernel, s1=s1, s2=s2, W=W, Wc=Wc)
    return pl.pallas_call(
        kernel,
        out_shape=jax.ShapeDtypeStruct((B, s0, s1, s2, Cc, Hc, Wc), x.dtype),
        grid=grid,
        in_specs=[in_spec],
        out_specs=out_spec,
        compiler_params=pltpu.CompilerParams(
            dimension_semantics=("parallel", "parallel"),
            vmem_limit_bytes=32 * 1024 * 1024),
        cost_estimate=pl.CostEstimate(
            flops=0, transcendentals=0,
            bytes_accessed=2 * x.size * itemsize),
    )(xr)


# ----------------------------------------------------------------------------
# Public wrapper + reference
# ----------------------------------------------------------------------------
def reshape_forward(x, split, map_type=1):
    """Pallas equivalent of reshape(split, map_type).forward(x)."""
    B, C, H, W = x.shape
    s0, s1, s2 = split
    assert C % s0 == 0 and H % s1 == 0 and W % s2 == 0
    if map_type == 1:
        return _forward_map1(x, split)
    elif map_type == 2:
        return _forward_map2(x, split)
    raise ValueError(f"unsupported map_type={map_type}")


def reshape_reference(x, split, map_type=1):
    """Pure-JAX reference mirroring the PyTorch module exactly."""
    B, C, H, W = x.shape
    s0, s1, s2 = split
    Cc, Hc, Wc = C // s0, H // s1, W // s2
    if map_type == 1:
        y = x.reshape(B, s0, Cc, s1, Hc, s2, Wc)
        return jnp.transpose(y, (0, 1, 3, 5, 2, 4, 6))
    else:
        y = x.reshape(B, Cc, s0, Hc, s1, Wc, s2)
        return jnp.transpose(y, (0, 2, 4, 6, 1, 3, 5))


if __name__ == "__main__":
    key = jax.random.PRNGKey(0)
    B, C, H, W = 2, 4, 16, 16
    x = jax.random.normal(key, (B, C, H, W), dtype=jnp.float32)

    # Exercise both map types (map_type=2 was previously untested) and a
    # second split to cover the s0 == 1 path.
    for split, map_type in [((2, 2, 2), 1), ((2, 2, 2), 2), ((1, 2, 2), 1)]:
        out = jax.block_until_ready(reshape_forward(x, split, map_type))
        ref = reshape_reference(x, split, map_type)
        s0, s1, s2 = split
        assert out.shape == (B, s0, s1, s2, C // s0, H // s1, W // s2), (
            split, map_type, out.shape)
        assert out.dtype == x.dtype
        assert jnp.allclose(out, ref), f"mismatch for split={split} map={map_type}"

    print("KERNEL_OK")
</pallas_src>

<mosaic_0001>
module attributes {stable_mosaic.version = 11 : i64} {
  func.func @_map1_kernel(%arg0: i32, %arg1: i32, %arg2: i32, %arg3: memref<2x2x8x16xf32, #tpu.memory_space<vmem>>, %arg4: memref<2x1x1x2x2x1x64xf32, #tpu.memory_space<vmem>>) attributes {dimension_semantics = [#tpu.dimension_semantics<parallel>, #tpu.dimension_semantics<parallel>, #tpu.dimension_semantics<parallel>], iteration_bounds = array<i64: 1, 2, 2>, scalar_prefetch = 0 : i64, scratch_operands = 0 : i64, tpu.core_type = #tpu.core_type<tc>, window_params = [{transform_indices = @transform_0, window_bounds = array<i64: 2, 2, 8, 16>}, {transform_indices = @transform_1, window_bounds = array<i64: 2, 1, 1, 2, 2, 1, 64>}]} {
    %c0 = arith.constant 0 : index
    %c0_0 = arith.constant 0 : index
    %c0_1 = arith.constant 0 : index
    %c0_2 = arith.constant 0 : index
    %0 = vector.load %arg3[%c0, %c0_0, %c0_1, %c0_2] : memref<2x2x8x16xf32, #tpu.memory_space<vmem>>, vector<2x2x1x16xf32>
    %1 = vector.extract_strided_slice %0 {offsets = [0, 0, 0, 0], sizes = [2, 2, 1, 8], strides = [1, 1, 1, 1]} : vector<2x2x1x16xf32> to vector<2x2x1x8xf32>
    %c0_3 = arith.constant 0 : index
    %c0_4 = arith.constant 0 : index
    %c0_5 = arith.constant 0 : index
    %c0_6 = arith.constant 0 : index
    %c0_7 = arith.constant 0 : index
    %c0_8 = arith.constant 0 : index
    %c0_9 = arith.constant 0 : index
    %2 = vector.load %arg4[%c0_3, %c0_4, %c0_5, %c0_6, %c0_7, %c0_8, %c0_9] : memref<2x1x1x2x2x1x64xf32, #tpu.memory_space<vmem>>, vector<2x1x1x1x2x1x8xf32>
    %3 = vector.shape_cast %2 : vector<2x1x1x1x2x1x8xf32> to vector<2x2x1x8xf32>
    %4 = vector.shape_cast %1 : vector<2x2x1x8xf32> to vector<2x1x1x1x2x1x8xf32>
    tpu.vector_store %arg4[%c0_3, %c0_4, %c0_5, %c0_6, %c0_7, %c0_8, %c0_9], %4 {strides = array<i32>} : memref<2x1x1x2x2x1x64xf32, #tpu.memory_space<vmem>>, vector<2x1x1x1x2x1x8xf32>,
    %c0_10 = arith.constant 0 : index
    %c0_11 = arith.constant 0 : index
    %c1 = arith.constant 1 : index
    %c0_12 = arith.constant 0 : index
    %5 = vector.load %arg3[%c0_10, %c0_11, %c1, %c0_12] : memref<2x2x8x16xf32, #tpu.memory_space<vmem>>, vector<2x2x1x16xf32>
    %6 = vector.extract_strided_slice %5 {offsets = [0, 0, 0, 0], sizes = [2, 2, 1, 8], strides = [1, 1, 1, 1]} : vector<2x2x1x16xf32> to vector<2x2x1x8xf32>
    %c0_13 = arith.constant 0 : index
    %c0_14 = arith.constant 0 : index
    %c0_15 = arith.constant 0 : index
    %c0_16 = arith.constant 0 : index
    %c0_17 = arith.constant 0 : index
    %c0_18 = arith.constant 0 : index
    %c8 = arith.constant 8 : index
    %7 = vector.load %arg4[%c0_13, %c0_14, %c0_15, %c0_16, %c0_17, %c0_18, %c8] : memref<2x1x1x2x2x1x64xf32, #tpu.memory_space<vmem>>, vector<2x1x1x1x2x1x8xf32>
    %8 = vector.shape_cast %7 : vector<2x1x1x1x2x1x8xf32> to vector<2x2x1x8xf32>
    %9 = vector.shape_cast %6 : vector<2x2x1x8xf32> to vector<2x1x1x1x2x1x8xf32>
    tpu.vector_store %arg4[%c0_13, %c0_14, %c0_15, %c0_16, %c0_17, %c0_18, %c8], %9 {strides = array<i32>} : memref<2x1x1x2x2x1x64xf32, #tpu.memory_space<vmem>>, vector<2x1x1x1x2x1x8xf32>,
    %c0_19 = arith.constant 0 : index
    %c0_20 = arith.constant 0 : index
    %c2 = arith.constant 2 : index
    %c0_21 = arith.constant 0 : index
    %10 = vector.load %arg3[%c0_19, %c0_20, %c2, %c0_21] : memref<2x2x8x16xf32, #tpu.memory_space<vmem>>, vector<2x2x1x16xf32>
    %11 = vector.extract_strided_slice %10 {offsets = [0, 0, 0, 0], sizes = [2, 2, 1, 8], strides = [1, 1, 1, 1]} : vector<2x2x1x16xf32> to vector<2x2x1x8xf32>
    %c0_22 = arith.constant 0 : index
    %c0_23 = arith.constant 0 : index
    %c0_24 = arith.constant 0 : index
    %c0_25 = arith.constant 0 : index
    %c0_26 = arith.constant 0 : index
    %c0_27 = arith.constant 0 : index
    %c16 = arith.constant 16 : index
    %12 = vector.load %arg4[%c0_22, %c0_23, %c0_24, %c0_25, %c0_26, %c0_27, %c16] : memref<2x1x1x2x2x1x64xf32, #tpu.memory_space<vmem>>, vector<2x1x1x1x2x1x8xf32>
    %13 = vector.shape_cast %12 : vector<2x1x1x1x2x1x8xf32> to vector<2x2x1x8xf32>
    %14 = vector.shape_cast %11 : vector<2x2x1x8xf32> to vector<2x1x1x1x2x1x8xf32>
    tpu.vector_store %arg4[%c0_22, %c0_23, %c0_24, %c0_25, %c0_26, %c0_27, %c16], %14 {strides = array<i32>} : memref<2x1x1x2x2x1x64xf32, #tpu.memory_space<vmem>>, vector<2x1x1x1x2x1x8xf32>,
    %c0_28 = arith.constant 0 : index
    %c0_29 = arith.constant 0 : index
    %c3 = arith.constant 3 : index
    %c0_30 = arith.constant 0 : index
    %15 = vector.load %arg3[%c0_28, %c0_29, %c3, %c0_30] : memref<2x2x8x16xf32, #tpu.memory_space<vmem>>, vector<2x2x1x16xf32>
    %16 = vector.extract_strided_slice %15 {offsets = [0, 0, 0, 0], sizes = [2, 2, 1, 8], strides = [1, 1, 1, 1]} : vector<2x2x1x16xf32> to vector<2x2x1x8xf32>
    %c0_31 = arith.constant 0 : index
    %c0_32 = arith.constant 0 : index
    %c0_33 = arith.constant 0 : index
    %c0_34 = arith.constant 0 : index
    %c0_35 = arith.constant 0 : index
    %c0_36 = arith.constant 0 : index
    %c24 = arith.constant 24 : index
    %17 = vector.load %arg4[%c0_31, %c0_32, %c0_33, %c0_34, %c0_35, %c0_36, %c24] : memref<2x1x1x2x2x1x64xf32, #tpu.memory_space<vmem>>, vector<2x1x1x1x2x1x8xf32>
    %18 = vector.shape_cast %17 : vector<2x1x1x1x2x1x8xf32> to vector<2x2x1x8xf32>
    %19 = vector.shape_cast %16 : vector<2x2x1x8xf32> to vector<2x1x1x1x2x1x8xf32>
    tpu.vector_store %arg4[%c0_31, %c0_32, %c0_33, %c0_34, %c0_35, %c0_36, %c24], %19 {strides = array<i32>} : memref<2x1x1x2x2x1x64xf32, #tpu.memory_space<vmem>>, vector<2x1x1x1x2x1x8xf32>,
    %c0_37 = arith.constant 0 : index
    %c0_38 = arith.constant 0 : index
    %c4 = arith.constant 4 : index
    %c0_39 = arith.constant 0 : index
    %20 = vector.load %arg3[%c0_37, %c0_38, %c4, %c0_39] : memref<2x2x8x16xf32, #tpu.memory_space<vmem>>, vector<2x2x1x16xf32>
    %21 = vector.extract_strided_slice %20 {offsets = [0, 0, 0, 0], sizes = [2, 2, 1, 8], strides = [1, 1, 1, 1]} : vector<2x2x1x16xf32> to vector<2x2x1x8xf32>
    %c0_40 = arith.constant 0 : index
    %c0_41 = arith.constant 0 : index
    %c0_42 = arith.constant 0 : index
    %c0_43 = arith.constant 0 : index
    %c0_44 = arith.constant 0 : index
    %c0_45 = arith.constant 0 : index
    %c32 = arith.constant 32 : index
    %22 = vector.load %arg4[%c0_40, %c0_41, %c0_42, %c0_43, %c0_44, %c0_45, %c32] : memref<2x1x1x2x2x1x64xf32, #tpu.memory_space<vmem>>, vector<2x1x1x1x2x1x8xf32>
    %23 = vector.shape_cast %22 : vector<2x1x1x1x2x1x8xf32> to vector<2x2x1x8xf32>
    %24 = vector.shape_cast %21 : vector<2x2x1x8xf32> to vector<2x1x1x1x2x1x8xf32>
    tpu.vector_store %arg4[%c0_40, %c0_41, %c0_42, %c0_43, %c0_44, %c0_45, %c32], %24 {strides = array<i32>} : memref<2x1x1x2x2x1x64xf32, #tpu.memory_space<vmem>>, vector<2x1x1x1x2x1x8xf32>,
    %c0_46 = arith.constant 0 : index
    %c0_47 = arith.constant 0 : index
    %c5 = arith.constant 5 : index
    %c0_48 = arith.constant 0 : index
    %25 = vector.load %arg3[%c0_46, %c0_47, %c5, %c0_48] : memref<2x2x8x16xf32, #tpu.memory_space<vmem>>, vector<2x2x1x16xf32>
    %26 = vector.extract_strided_slice %25 {offsets = [0, 0, 0, 0], sizes = [2, 2, 1, 8], strides = [1, 1, 1, 1]} : vector<2x2x1x16xf32> to vector<2x2x1x8xf32>
    %c0_49 = arith.constant 0 : index
    %c0_50 = arith.constant 0 : index
    %c0_51 = arith.constant 0 : index
    %c0_52 = arith.constant 0 : index
    %c0_53 = arith.constant 0 : index
    %c0_54 = arith.constant 0 : index
    %c40 = arith.constant 40 : index
    %27 = vector.load %arg4[%c0_49, %c0_50, %c0_51, %c0_52, %c0_53, %c0_54, %c40] : memref<2x1x1x2x2x1x64xf32, #tpu.memory_space<vmem>>, vector<2x1x1x1x2x1x8xf32>
    %28 = vector.shape_cast %27 : vector<2x1x1x1x2x1x8xf32> to vector<2x2x1x8xf32>
    %29 = vector.shape_cast %26 : vector<2x2x1x8xf32> to vector<2x1x1x1x2x1x8xf32>
    tpu.vector_store %arg4[%c0_49, %c0_50, %c0_51, %c0_52, %c0_53, %c0_54, %c40], %29 {strides = array<i32>} : memref<2x1x1x2x2x1x64xf32, #tpu.memory_space<vmem>>, vector<2x1x1x1x2x1x8xf32>,
    %c0_55 = arith.constant 0 : index
    %c0_56 = arith.constant 0 : index
    %c6 = arith.constant 6 : index
    %c0_57 = arith.constant 0 : index
    %30 = vector.load %arg3[%c0_55, %c0_56, %c6, %c0_57] : memref<2x2x8x16xf32, #tpu.memory_space<vmem>>, vector<2x2x1x16xf32>
    %31 = vector.extract_strided_slice %30 {offsets = [0, 0, 0, 0], sizes = [2, 2, 1, 8], strides = [1, 1, 1, 1]} : vector<2x2x1x16xf32> to vector<2x2x1x8xf32>
    %c0_58 = arith.constant 0 : index
    %c0_59 = arith.constant 0 : index
    %c0_60 = arith.constant 0 : index
    %c0_61 = arith.constant 0 : index
    %c0_62 = arith.constant 0 : index
    %c0_63 = arith.constant 0 : index
    %c48 = arith.constant 48 : index
    %32 = vector.load %arg4[%c0_58, %c0_59, %c0_60, %c0_61, %c0_62, %c0_63, %c48] : memref<2x1x1x2x2x1x64xf32, #tpu.memory_space<vmem>>, vector<2x1x1x1x2x1x8xf32>
    %33 = vector.shape_cast %32 : vector<2x1x1x1x2x1x8xf32> to vector<2x2x1x8xf32>
    %34 = vector.shape_cast %31 : vector<2x2x1x8xf32> to vector<2x1x1x1x2x1x8xf32>
    tpu.vector_store %arg4[%c0_58, %c0_59, %c0_60, %c0_61, %c0_62, %c0_63, %c48], %34 {strides = array<i32>} : memref<2x1x1x2x2x1x64xf32, #tpu.memory_space<vmem>>, vector<2x1x1x1x2x1x8xf32>,
    %c0_64 = arith.constant 0 : index
    %c0_65 = arith.constant 0 : index
    %c7 = arith.constant 7 : index
    %c0_66 = arith.constant 0 : index
    %35 = vector.load %arg3[%c0_64, %c0_65, %c7, %c0_66] : memref<2x2x8x16xf32, #tpu.memory_space<vmem>>, vector<2x2x1x16xf32>
    %36 = vector.extract_strided_slice %35 {offsets = [0, 0, 0, 0], sizes = [2, 2, 1, 8], strides = [1, 1, 1, 1]} : vector<2x2x1x16xf32> to vector<2x2x1x8xf32>
    %c0_67 = arith.constant 0 : index
    %c0_68 = arith.constant 0 : index
    %c0_69 = arith.constant 0 : index
    %c0_70 = arith.constant 0 : index
    %c0_71 = arith.constant 0 : index
    %c0_72 = arith.constant 0 : index
    %c56 = arith.constant 56 : index
    %37 = vector.load %arg4[%c0_67, %c0_68, %c0_69, %c0_70, %c0_71, %c0_72, %c56] : memref<2x1x1x2x2x1x64xf32, #tpu.memory_space<vmem>>, vector<2x1x1x1x2x1x8xf32>
    %38 = vector.shape_cast %37 : vector<2x1x1x1x2x1x8xf32> to vector<2x2x1x8xf32>
    %39 = vector.shape_cast %36 : vector<2x2x1x8xf32> to vector<2x1x1x1x2x1x8xf32>
    tpu.vector_store %arg4[%c0_67, %c0_68, %c0_69, %c0_70, %c0_71, %c0_72, %c56], %39 {strides = array<i32>} : memref<2x1x1x2x2x1x64xf32, #tpu.memory_space<vmem>>, vector<2x1x1x1x2x1x8xf32>,
    %c0_73 = arith.constant 0 : index
    %c0_74 = arith.constant 0 : index
    %c0_75 = arith.constant 0 : index
    %c0_76 = arith.constant 0 : index
    %40 = vector.load %arg3[%c0_73, %c0_74, %c0_75, %c0_76] : memref<2x2x8x16xf32, #tpu.memory_space<vmem>>, vector<2x2x1x16xf32>
    %41 = vector.extract_strided_slice %40 {offsets = [0, 0, 0, 8], sizes = [2, 2, 1, 8], strides = [1, 1, 1, 1]} : vector<2x2x1x16xf32> to vector<2x2x1x8xf32>
    %c0_77 = arith.constant 0 : index
    %c0_78 = arith.constant 0 : index
    %c0_79 = arith.constant 0 : index
    %c1_80 = arith.constant 1 : index
    %c0_81 = arith.constant 0 : index
    %c0_82 = arith.constant 0 : index
    %c0_83 = arith.constant 0 : index
    %42 = vector.load %arg4[%c0_77, %c0_78, %c0_79, %c1_80, %c0_81, %c0_82, %c0_83] : memref<2x1x1x2x2x1x64xf32, #tpu.memory_space<vmem>>, vector<2x1x1x1x2x1x8xf32>
    %43 = vector.shape_cast %42 : vector<2x1x1x1x2x1x8xf32> to vector<2x2x1x8xf32>
    %44 = vector.shape_cast %41 : vector<2x2x1x8xf32> to vector<2x1x1x1x2x1x8xf32>
    tpu.vector_store %arg4[%c0_77, %c0_78, %c0_79, %c1_80, %c0_81, %c0_82, %c0_83], %44 {strides = array<i32>} : memref<2x1x1x2x2x1x64xf32, #tpu.memory_space<vmem>>, vector<2x1x1x1x2x1x8xf32>,
    %c0_84 = arith.constant 0 : index
    %c0_85 = arith.constant 0 : index
    %c1_86 = arith.constant 1 : index
    %c0_87 = arith.constant 0 : index
    %45 = vector.load %arg3[%c0_84, %c0_85, %c1_86, %c0_87] : memref<2x2x8x16xf32, #tpu.memory_space<vmem>>, vector<2x2x1x16xf32>
    %46 = vector.extract_strided_slice %45 {offsets = [0, 0, 0, 8], sizes = [2, 2, 1, 8], strides = [1, 1, 1, 1]} : vector<2x2x1x16xf32> to vector<2x2x1x8xf32>
    %c0_88 = arith.constant 0 : index
    %c0_89 = arith.constant 0 : index
    %c0_90 = arith.constant 0 : index
    %c1_91 = arith.constant 1 : index
    %c0_92 = arith.constant 0 : index
    %c0_93 = arith.constant 0 : index
    %c8_94 = arith.constant 8 : index
    %47 = vector.load %arg4[%c0_88, %c0_89, %c0_90, %c1_91, %c0_92, %c0_93, %c8_94] : memref<2x1x1x2x2x1x64xf32, #tpu.memory_space<vmem>>, vector<2x1x1x1x2x1x8xf32>
    %48 = vector.shape_cast %47 : vector<2x1x1x1x2x1x8xf32> to vector<2x2x1x8xf32>
    %49 = vector.shape_cast %46 : vector<2x2x1x8xf32> to vector<2x1x1x1x2x1x8xf32>
    tpu.vector_store %arg4[%c0_88, %c0_89, %c0_90, %c1_91, %c0_92, %c0_93, %c8_94], %49 {strides = array<i32>} : memref<2x1x1x2x2x1x64xf32, #tpu.memory_space<vmem>>, vector<2x1x1x1x2x1x8xf32>,
    %c0_95 = arith.constant 0 : index
    %c0_96 = arith.constant 0 : index
    %c2_97 = arith.constant 2 : index
    %c0_98 = arith.constant 0 : index
    %50 = vector.load %arg3[%c0_95, %c0_96, %c2_97, %c0_98] : memref<2x2x8x16xf32, #tpu.memory_space<vmem>>, vector<2x2x1x16xf32>
    %51 = vector.extract_strided_slice %50 {offsets = [0, 0, 0, 8], sizes = [2, 2, 1, 8], strides = [1, 1, 1, 1]} : vector<2x2x1x16xf32> to vector<2x2x1x8xf32>
    %c0_99 = arith.constant 0 : index
    %c0_100 = arith.constant 0 : index
    %c0_101 = arith.constant 0 : index
    %c1_102 = arith.constant 1 : index
    %c0_103 = arith.constant 0 : index
    %c0_104 = arith.constant 0 : index
    %c16_105 = arith.constant 16 : index
    %52 = vector.load %arg4[%c0_99, %c0_100, %c0_101, %c1_102, %c0_103, %c0_104, %c16_105] : memref<2x1x1x2x2x1x64xf32, #tpu.memory_space<vmem>>, vector<2x1x1x1x2x1x8xf32>
    %53 = vector.shape_cast %52 : vector<2x1x1x1x2x1x8xf32> to vector<2x2x1x8xf32>
    %54 = vector.shape_cast %51 : vector<2x2x1x8xf32> to vector<2x1x1x1x2x1x8xf32>
    tpu.vector_store %arg4[%c0_99, %c0_100, %c0_101, %c1_102, %c0_103, %c0_104, %c16_105], %54 {strides = array<i32>} : memref<2x1x1x2x2x1x64xf32, #tpu.memory_space<vmem>>, vector<2x1x1x1x2x1x8xf32>,
    %c0_106 = arith.constant 0 : index
    %c0_107 = arith.constant 0 : index
    %c3_108 = arith.constant 3 : index
    %c0_109 = arith.constant 0 : index
    %55 = vector.load %arg3[%c0_106, %c0_107, %c3_108, %c0_109] : memref<2x2x8x16xf32, #tpu.memory_space<vmem>>, vector<2x2x1x16xf32>
    %56 = vector.extract_strided_slice %55 {offsets = [0, 0, 0, 8], sizes = [2, 2, 1, 8], strides = [1, 1, 1, 1]} : vector<2x2x1x16xf32> to vector<2x2x1x8xf32>
    %c0_110 = arith.constant 0 : index
    %c0_111 = arith.constant 0 : index
    %c0_112 = arith.constant 0 : index
    %c1_113 = arith.constant 1 : index
    %c0_114 = arith.constant 0 : index
    %c0_115 = arith.constant 0 : index
    %c24_116 = arith.constant 24 : index
    %57 = vector.load %arg4[%c0_110, %c0_111, %c0_112, %c1_113, %c0_114, %c0_115, %c24_116] : memref<2x1x1x2x2x1x64xf32, #tpu.memory_space<vmem>>, vector<2x1x1x1x2x1x8xf32>
    %58 = vector.shape_cast %57 : vector<2x1x1x1x2x1x8xf32> to vector<2x2x1x8xf32>
    %59 = vector.shape_cast %56 : vector<2x2x1x8xf32> to vector<2x1x1x1x2x1x8xf32>
    tpu.vector_store %arg4[%c0_110, %c0_111, %c0_112, %c1_113, %c0_114, %c0_115, %c24_116], %59 {strides = array<i32>} : memref<2x1x1x2x2x1x64xf32, #tpu.memory_space<vmem>>, vector<2x1x1x1x2x1x8xf32>,
    %c0_117 = arith.constant 0 : index
    %c0_118 = arith.constant 0 : index
    %c4_119 = arith.constant 4 : index
    %c0_120 = arith.constant 0 : index
    %60 = vector.load %arg3[%c0_117, %c0_118, %c4_119, %c0_120] : memref<2x2x8x16xf32, #tpu.memory_space<vmem>>, vector<2x2x1x16xf32>
    %61 = vector.extract_strided_slice %60 {offsets = [0, 0, 0, 8], sizes = [2, 2, 1, 8], strides = [1, 1, 1, 1]} : vector<2x2x1x16xf32> to vector<2x2x1x8xf32>
    %c0_121 = arith.constant 0 : index
    %c0_122 = arith.constant 0 : index
    %c0_123 = arith.constant 0 : index
    %c1_124 = arith.constant 1 : index
    %c0_125 = arith.constant 0 : index
    %c0_126 = arith.constant 0 : index
    %c32_127 = arith.constant 32 : index
    %62 = vector.load %arg4[%c0_121, %c0_122, %c0_123, %c1_124, %c0_125, %c0_126, %c32_127] : memref<2x1x1x2x2x1x64xf32, #tpu.memory_space<vmem>>, vector<2x1x1x1x2x1x8xf32>
    %63 = vector.shape_cast %62 : vector<2x1x1x1x2x1x8xf32> to vector<2x2x1x8xf32>
    %64 = vector.shape_cast %61 : vector<2x2x1x8xf32> to vector<2x1x1x1x2x1x8xf32>
    tpu.vector_store %arg4[%c0_121, %c0_122, %c0_123, %c1_124, %c0_125, %c0_126, %c32_127], %64 {strides = array<i32>} : memref<2x1x1x2x2x1x64xf32, #tpu.memory_space<vmem>>, vector<2x1x1x1x2x1x8xf32>,
    %c0_128 = arith.constant 0 : index
    %c0_129 = arith.constant 0 : index
    %c5_130 = arith.constant 5 : index
    %c0_131 = arith.constant 0 : index
    %65 = vector.load %arg3[%c0_128, %c0_129, %c5_130, %c0_131] : memref<2x2x8x16xf32, #tpu.memory_space<vmem>>, vector<2x2x1x16xf32>
    %66 = vector.extract_strided_slice %65 {offsets = [0, 0, 0, 8], sizes = [2, 2, 1, 8], strides = [1, 1, 1, 1]} : vector<2x2x1x16xf32> to vector<2x2x1x8xf32>
    %c0_132 = arith.constant 0 : index
    %c0_133 = arith.constant 0 : index
    %c0_134 = arith.constant 0 : index
    %c1_135 = arith.constant 1 : index
    %c0_136 = arith.constant 0 : index
    %c0_137 = arith.constant 0 : index
    %c40_138 = arith.constant 40 : index
    %67 = vector.load %arg4[%c0_132, %c0_133, %c0_134, %c1_135, %c0_136, %c0_137, %c40_138] : memref<2x1x1x2x2x1x64xf32, #tpu.memory_space<vmem>>, vector<2x1x1x1x2x1x8xf32>
    %68 = vector.shape_cast %67 : vector<2x1x1x1x2x1x8xf32> to vector<2x2x1x8xf32>
    %69 = vector.shape_cast %66 : vector<2x2x1x8xf32> to vector<2x1x1x1x2x1x8xf32>
    tpu.vector_store %arg4[%c0_132, %c0_133, %c0_134, %c1_135, %c0_136, %c0_137, %c40_138], %69 {strides = array<i32>} : memref<2x1x1x2x2x1x64xf32, #tpu.memory_space<vmem>>, vector<2x1x1x1x2x1x8xf32>,
    %c0_139 = arith.constant 0 : index
    %c0_140 = arith.constant 0 : index
    %c6_141 = arith.constant 6 : index
    %c0_142 = arith.constant 0 : index
    %70 = vector.load %arg3[%c0_139, %c0_140, %c6_141, %c0_142] : memref<2x2x8x16xf32, #tpu.memory_space<vmem>>, vector<2x2x1x16xf32>
    %71 = vector.extract_strided_slice %70 {offsets = [0, 0, 0, 8], sizes = [2, 2, 1, 8], strides = [1, 1, 1, 1]} : vector<2x2x1x16xf32> to vector<2x2x1x8xf32>
    %c0_143 = arith.constant 0 : index
    %c0_144 = arith.constant 0 : index
    %c0_145 = arith.constant 0 : index
    %c1_146 = arith.constant 1 : index
    %c0_147 = arith.constant 0 : index
    %c0_148 = arith.constant 0 : index
    %c48_149 = arith.constant 48 : index
    %72 = vector.load %arg4[%c0_143, %c0_144, %c0_145, %c1_146, %c0_147, %c0_148, %c48_149] : memref<2x1x1x2x2x1x64xf32, #tpu.memory_space<vmem>>, vector<2x1x1x1x2x1x8xf32>
    %73 = vector.shape_cast %72 : vector<2x1x1x1x2x1x8xf32> to vector<2x2x1x8xf32>
    %74 = vector.shape_cast %71 : vector<2x2x1x8xf32> to vector<2x1x1x1x2x1x8xf32>
    tpu.vector_store %arg4[%c0_143, %c0_144, %c0_145, %c1_146, %c0_147, %c0_148, %c48_149], %74 {strides = array<i32>} : memref<2x1x1x2x2x1x64xf32, #tpu.memory_space<vmem>>, vector<2x1x1x1x2x1x8xf32>,
    %c0_150 = arith.constant 0 : index
    %c0_151 = arith.constant 0 : index
    %c7_152 = arith.constant 7 : index
    %c0_153 = arith.constant 0 : index
    %75 = vector.load %arg3[%c0_150, %c0_151, %c7_152, %c0_153] : memref<2x2x8x16xf32, #tpu.memory_space<vmem>>, vector<2x2x1x16xf32>
    %76 = vector.extract_strided_slice %75 {offsets = [0, 0, 0, 8], sizes = [2, 2, 1, 8], strides = [1, 1, 1, 1]} : vector<2x2x1x16xf32> to vector<2x2x1x8xf32>
    %c0_154 = arith.constant 0 : index
    %c0_155 = arith.constant 0 : index
    %c0_156 = arith.constant 0 : index
    %c1_157 = arith.constant 1 : index
    %c0_158 = arith.constant 0 : index
    %c0_159 = arith.constant 0 : index
    %c56_160 = arith.constant 56 : index
    %77 = vector.load %arg4[%c0_154, %c0_155, %c0_156, %c1_157, %c0_158, %c0_159, %c56_160] : memref<2x1x1x2x2x1x64xf32, #tpu.memory_space<vmem>>, vector<2x1x1x1x2x1x8xf32>
    %78 = vector.shape_cast %77 : vector<2x1x1x1x2x1x8xf32> to vector<2x2x1x8xf32>
    %79 = vector.shape_cast %76 : vector<2x2x1x8xf32> to vector<2x1x1x1x2x1x8xf32>
    tpu.vector_store %arg4[%c0_154, %c0_155, %c0_156, %c1_157, %c0_158, %c0_159, %c56_160], %79 {strides = array<i32>} : memref<2x1x1x2x2x1x64xf32, #tpu.memory_space<vmem>>, vector<2x1x1x1x2x1x8xf32>,
    return
  }
  func.func @transform_0(%arg0: i32, %arg1: i32, %arg2: i32) -> (i32, i32, i32, i32) {
    %c0_i32 = arith.constant 0 : i32
    %c0_i32_0 = arith.constant 0 : i32
    return %arg0, %arg1, %arg2, %c0_i32 : i32, i32, i32, i32
  }
  func.func @transform_1(%arg0: i32, %arg1: i32, %arg2: i32) -> (i32, i32, i32, i32, i32, i32, i32) {
    %c0_i32 = arith.constant 0 : i32
    %c0_i32_0 = arith.constant 0 : i32
    %c0_i32_1 = arith.constant 0 : i32
    %c0_i32_2 = arith.constant 0 : i32
    %c0_i32_3 = arith.constant 0 : i32
    return %arg0, %arg1, %arg2, %c0_i32, %c0_i32_0, %c0_i32_1, %c0_i32_2 : i32, i32, i32, i32, i32, i32, i32
  }
}

</mosaic_0001>

<bundles_post_ra>
// kernel: tpu_custom_call.1
= control target key start
LH: loop header
LB: loop body
LE: loop exit
PB: predicated region body
PF: predicated region fallthrough
CT: control target
= control target key end

     0   :  { %6 = vsyncpa [#allocation3], 0  ;;  %s1363_s0 = inlined_call_operand.hbm [shape: f32[2,4,16,16], index: 0, kind: input, shape index: {}]   ;;  %s1364_s1 = inlined_call_operand.hbm [shape: f32[2,2,2,2,2,1,64], index: 1, kind: output, shape index: {}]  }
   0x1   :  { %8 = vsyncpa [#allocation3 + $0x1], 0 }
   0x2   :  { %9 = vsyncpa [#allocation4], 0 }
   0x3   :  { %11 = vsyncpa [#allocation4 + $0x1], 0  ;;  %s957_s6 = smov 0   ;;  %s959_s7 = smov 0  }
   0x4   :  { %s961_s8 = smov 0   ;;  %s963_s9 = smov 0  }
   0x5   :  { %s965_s10 = smov 0   ;;  %s967_s11 = smov 0  }
   0x6   :  { %s969_s12 = smov 0   ;;  %s971_s13 = smov 0  }
   0x7 LB: > { %s696_s14 = sadd.s32 4294967295, %s924_s13   ;;  %s697_s15 = sadd.s32 4294967294, %s924_s13   ;;  %s924_s13 = sphi %s971_s13, %s17_s13   ;;  %s920_s12 = sphi %s969_s12, %s1375_s12   ;;  %s916_s11 = sphi %s967_s11, %s1374_s11   ;;  %s912_s10 = sphi %s965_s10, %s1373_s10   ;;  %s908_s9 = sphi %s963_s9, %s1372_s9   ;;  %s904_s8 = sphi %s961_s8, %s1371_s8   ;;  %s900_s7 = sphi %s959_s7, %s1370_s7   ;;  %s896_s6 = sphi %s957_s6, %s1369_s6  }
   0x8   : > { %s29_s16 = sadd.s32 1, %s916_s11  ;;  %s32_s17 = sadd.s32 1, %s920_s12 }
   0x9   : > { %p30_p0 = scmp.ge.s32.totalorder %s29_s16, 2  ;;  %p54_p1 = scmp.ne.s32.totalorder %s904_s8, %s900_s7 }
   0xa   : > { %p55_p2 = scmp.eq.s32.totalorder %s924_s13, 0  ;;  %p60_p5 = scmp.ne.s32.totalorder %s900_s7, %s896_s6 }
   0xb   : > { %s1377_s16 = smov (%p30_p0, %s29_s16), 0  ;;  %s1379_s17 = smov (!%p30_p0, %s32_s17), %s920_s12 }
   0xc   : > { %s43_s18 = ssub.s32 %s916_s11, %s1377_s16  ;;  %p1009_p3 = por %p55_p2, %p54_p1 }
   0xd   : > { %p34_p4 = scmp.ge.s32.totalorder %s1379_s17, 2  ;;  %p61_p6 = scmp.eq.s32.totalorder %s696_s14, 0 }
   0xe   : > { %p88_p7 = scmp.eq.s32.totalorder %s696_s14, 3  ;;  %p94_p10 = scmp.eq.s32.totalorder %s697_s15, 3 }
   0xf   : > { %s1381_s17 = smov (%p34_p4, %s1379_s17), 0  ;;  %p1017_p8 = por %p61_p6, %p60_p5 }
  0x10   : > { %p1021_p9 = por %p88_p7, %p54_p1  ;;  %s41_s22 = ssub.s32 %s920_s12, %s1381_s17 }
  0x11   : > { %s44_s23 = sor.u32 %s43_s18, %s41_s22  ;;  %s47_s24 = sadd.s32 1, %s904_s8 }
  0x12   : > { %p45_p11 = scmp.eq.s32.totalorder %s44_s23, 0  ;;  %p1028_p12 = por %p94_p10, %p60_p5 }
  0x13   : > { %p699_p13 = scmp.ge.s32.totalorder %s924_s13, 4 }
  0x14   : > { %s1033_s26 = scalar_select %p45_p11, %s904_s8, %s47_s24  }
  0x15   : > { %110 = sbr.rel (%p699_p13) target bundleno = 41 (0x29), region = 16 }
  0x1a   : > { %s114_s27 = sand.u32 1, %s904_s8   ;;  %s746_s28 = sshll.u32 %s920_s12, 2 }
  0x1b   : > { %s700_s29 = sshll.u32 %s114_s27, 5  ;;  %s124_s30 = sadd.s32 %s916_s11, %s746_s28 }
  0x1c   : > { %s703_s2 = sshll.u32 %s124_s30, 3  ;;  %s118_s3 = scalar_lea.vmem [#allocation2], %s700_s29 }
  0x1d   : > { %s143_s4 = sshll.u32 %s118_s3, 4  ;;  %s128_s15 = scalar_lea.hbm %s1363_s0, %s703_s2  ;;  %s144_s4 = int_to_ptr.vmem [resolvable:$true] %s143_s4 }
  0x1e   : > { %s747_s18 = scalar_select %p1009_p3, [#allocation0], [#allocation10] }
  0x1f   : > { %s141_s22 = sshll.u32 %s128_s15, 4  ;;  %s926_s24 = smov 1024   ;;  %s142_s22 = int_to_ptr.hbm [resolvable:$true] %s141_s22 }
  0x20   : > { %s133_s23 = sld [smem:[%s747_s18]]   ;;  %s927_s28 = smov 256  }
  0x21   : > { %748 = sst [smem:[#allocation7]] (%p1009_p3), %s926_s24  ;;  %s928_s29 = smov 2  }
  0x22   : > { %749 = sst [smem:[#allocation7 + $0x1]] (%p1009_p3), %s927_s28  ;;  %s929_s30 = smov 128  }
  0x23   : > { %750 = sst [smem:[#allocation7 + $0x2]] (%p1009_p3), %s928_s29  ;;  %s930_s3 = smov 8  }
  0x24   : > { %751 = sst [smem:[#allocation7 + $0x3]] (%p1009_p3), %s927_s28  ;;  %s115_s14 = scalar_lea.sflag [#allocation3], %s114_s27 }
  0x25   : > { %752 = sst [smem:[#allocation7 + $0x4]] (%p1009_p3), %s929_s30  ;;  %s931_s15 = smov [#allocation6]  }
  0x26   : > { %s704_s2 = sshll.u32 %s133_s23, 26  ;;  %753 = sst [smem:[#allocation7 + $0x5]] (%p1009_p3), %s930_s3 }
  0x27   : > { %s705_s5 = sadd.s32 134217728, %s704_s2 }
  0x28   : > { %754 = dma.general (%p1009_p3), %s142_s22, 512, %s144_s4, %s115_s14, %s931_s15, [#allocation7], %s705_s5, 0  }
  0x29 PF: > { %p706_p0 = scmp.ge.s32.totalorder %s924_s13, 1  ;;  %p164_p1 = scmp.lt.s32.totalorder %s924_s13, 5 }
  0x2b   : > { %p165_p2 = pnand %p706_p0, %p164_p1 }
  0x2c   : > { %s1061_s18 = sand.u32 (!%p165_p2), 1, %s900_s7  }
  0x2d   : > { %168 = sbr.rel (%p165_p2) target bundleno = 324 (0x144), region = 24  ;;  %s707_s23 = sshll.u32 (!%p165_p2), %s1061_s18, 5 }
  0x2e   : > { %s171_s24 = scalar_lea.sflag (!%p165_p2), [#allocation3], %s1061_s18  ;;  %s1065_s28 = scalar_lea.vmem (!%p165_p2), [#allocation2], %s707_s23 }
  0x32   : > { %887 = dma.done.wait (%p1017_p8), %s171_s24, 512  }
  0x33   : > { %889 = vsyncadd (%p1017_p8), %s171_s24, 4294966784  ;;  %v208_v0 = vld [vmem:[%s1065_s28 + $0x11] sm:$0x1]  ;;  %v206_v1 = vld [vmem:[%s1065_s28 + $0x1] sm:$0x1]  ;;  %s932_s19 = smov 8  }
  0x34   : > { %218 = vrot.lane.b32.xlu1 %v208_v0, %s932_s19  ;;  %214 = vrot.lane.b32.xlu0 %v206_v1, %s932_s19  ;;  %v231_v2 = vld [vmem:[%s1065_s28 + $0x2] sm:$0x1]  ;;  %s933_s20 = smov 16   ;;  %v209_v3 = vld [vmem:[%s1065_s28 + $0x19] sm:$0x1]  ;;  %s934_s27 = smov 24  }
  0x35   : > { %239 = vrot.lane.b32.xlu2 %v231_v2, %s933_s20  ;;  %v207_v4 = vld [vmem:[%s1065_s28 + $0x9] sm:$0x1]  ;;  %v232_v5 = vld [vmem:[%s1065_s28 + $0xa] sm:$0x1]  ;;  %v234_v6 = vld [vmem:[%s1065_s28 + $0x1a] sm:$0x1] }
  0x36   : > { %v233_v7 = vld [vmem:[%s1065_s28 + $0x12] sm:$0x1]  ;;  %v256_v8 = vld [vmem:[%s1065_s28 + $0x3] sm:$0x1]  ;;  %v258_v9 = vld [vmem:[%s1065_s28 + $0x13] sm:$0x1] }
  0x37   : > { %v257_v10 = vld [vmem:[%s1065_s28 + $0xb] sm:$0x1]  ;;  %v259_v11 = vld [vmem:[%s1065_s28 + $0x1b] sm:$0x1]  ;;  %v282_v12 = vld [vmem:[%s1065_s28 + $0xc] sm:$0x1] }
  0x38   : > { %v281_v13 = vld [vmem:[%s1065_s28 + $0x4] sm:$0x1]  ;;  %s935_s4 = smov 32   ;;  %v283_v14 = vld [vmem:[%s1065_s28 + $0x14] sm:$0x1]  ;;  %s936_s22 = smov 40  }
  0x39   : > { %v306_v15 = vld [vmem:[%s1065_s28 + $0x5] sm:$0x1]  ;;  %v284_v16 = vld [vmem:[%s1065_s28 + $0x1c] sm:$0x1]  ;;  %v307_v17 = vld [vmem:[%s1065_s28 + $0xd] sm:$0x1] }
  0x3a   : > { %v309_v18 = vld [vmem:[%s1065_s28 + $0x1d] sm:$0x1]  ;;  %v308_v19 = vld [vmem:[%s1065_s28 + $0x15] sm:$0x1]  ;;  %v331_v20 = vld [vmem:[%s1065_s28 + $0x6] sm:$0x1] }
  0x3b   : > { %s937_s29 = smov 48   ;;  %v333_v21 = vld [vmem:[%s1065_s28 + $0x16] sm:$0x1]  ;;  %v332_v22 = vld [vmem:[%s1065_s28 + $0xe] sm:$0x1]  ;;  %s938_s30 = smov 56  }
  0x3c   : > { %220 = vrot.lane.b32.xlu1 %v209_v3, %s932_s19  ;;  %216 = vrot.lane.b32.xlu0 %v207_v4, %s932_s19  ;;  %v334_v23 = vld [vmem:[%s1065_s28 + $0x1e] sm:$0x1]  ;;  %v357_v24 = vld [vmem:[%s1065_s28 + $0xf] sm:$0x1]  ;;  %s939_s2 = smov 120   ;;  %s708_s3 = sshll.u32 %s1061_s18, 3 }
  0x3d   : > { %241 = vrot.lane.b32.xlu2 %v232_v5, %s933_s20  ;;  %v356_v25 = vld [vmem:[%s1065_s28 + $0x7] sm:$0x1]  ;;  %v358_v26 = vld [vmem:[%s1065_s28 + $0x17] sm:$0x1]  ;;  %v381_v27 = vld [vmem:[%s1065_s28] sm:$0x1] }
  0x3e   : > { %v359_v28 = vld [vmem:[%s1065_s28 + $0x1f] sm:$0x1]  ;;  %v382_v29 = vld [vmem:[%s1065_s28 + $0x8] sm:$0x1]  ;;  %v384_v30 = vld [vmem:[%s1065_s28 + $0x18] sm:$0x1] }
  0x3f   : > { %v383_v31 = vld [vmem:[%s1065_s28 + $0x10] sm:$0x1]  ;;  %v414_v32 = vld [vmem:[%s1065_s28 + $0x2] sm:$0x1]  ;;  %vm201_vm0 = vcmask 57344   ;;  %s1131_s5 = scalar_lea.vmem [#allocation5], %s708_s3 }
  0x40   : > { %v199_v33 = vld [vmem:[%s1065_s28 + $0x10] sm:$0x1]  ;;  %v197_v34 = vld [vmem:[%s1065_s28] sm:$0x1]  ;;  %v416_v35 = vld [vmem:[%s1065_s28 + $0x12] sm:$0x1] }
  0x41   : > { %204 = vst.msk [vmem:[%s1131_s5 + $0x4] sm:$0x1] %vm201_vm0, %v199_v33  ;;  %v415_v36 = vld [vmem:[%s1065_s28 + $0xa] sm:$0x1]  ;;  %v417_v37 = vld [vmem:[%s1065_s28 + $0x1a] sm:$0x1] }
  0x42   : > { %202 = vst.msk [vmem:[%s1131_s5] sm:$0x1] %vm201_vm0, %v197_v34  ;;  %v200_v38 = vld [vmem:[%s1065_s28 + $0x18] sm:$0x1]  ;;  %v198_v39 = vld [vmem:[%s1065_s28 + $0x8] sm:$0x1] }
  0x43   : > { %205 = vst.msk [vmem:[%s1131_s5 + $0x5] sm:$0x1] %vm201_vm0, %v200_v38  ;;  %v439_v40 = vld [vmem:[%s1065_s28 + $0xb] sm:$0x1]  ;;  %v438_v41 = vld [vmem:[%s1065_s28 + $0x3] sm:$0x1] }
  0x44   : > { %245 = vrot.lane.b32.xlu1 %v234_v6, %s933_s20  ;;  %243 = vrot.lane.b32.xlu0 %v233_v7, %s933_s20  ;;  %203 = vst.msk [vmem:[%s1131_s5 + $0x1] sm:$0x1] %vm201_vm0, %v198_v39  ;;  %v440_v43 = vld [vmem:[%s1065_s28 + $0x13] sm:$0x1]  ;;  %vm226_vm1 = vcmask 122944   ;;  %vm251_vm2 = vcmask 188544  }
  0x45   : > { %264 = vrot.lane.b32.xlu2 %v256_v8, %s934_s27  ;;  %v462_v44 = vld [vmem:[%s1065_s28 + $0x4] sm:$0x1]  ;;  %v441_v45 = vld [vmem:[%s1065_s28 + $0x1b] sm:$0x1]  ;;  %v463_v47 = vld [vmem:[%s1065_s28 + $0xc] sm:$0x1] }
  0x46   : > { %v465_v48 = vld [vmem:[%s1065_s28 + $0x1c] sm:$0x1]  ;;  %v464_v49 = vld [vmem:[%s1065_s28 + $0x14] sm:$0x1]  ;;  %v486_v51 = vld [vmem:[%s1065_s28 + $0x5] sm:$0x1] }
  0x47   : > { %vm276_vm3 = vcmask 254144   ;;  %v488_v54 = vld [vmem:[%s1065_s28 + $0x15] sm:$0x1]  ;;  %v487_v55 = vld [vmem:[%s1065_s28 + $0xd] sm:$0x1]  ;;  %vm301_vm4 = vcmask 319744  }
  0x48   : > { %v489_v57 = vld [vmem:[%s1065_s28 + $0x1d] sm:$0x1]  ;;  %v511_v60 = vld [vmem:[%s1065_s28 + $0xe] sm:$0x1]  ;;  %v510_v61 = vld [vmem:[%s1065_s28 + $0x6] sm:$0x1] }
  0x49   : > { %v512_v63 = vld [vmem:[%s1065_s28 + $0x16] sm:$0x1]  ;;  %v534_v2 = vld [vmem:[%s1065_s28 + $0x7] sm:$0x1]  ;;  %v513_v3 = vld [vmem:[%s1065_s28 + $0x1e] sm:$0x1] }
  0x4a   : > { %v535_v5 = vld [vmem:[%s1065_s28 + $0xf] sm:$0x1]  ;;  %v537_v8 = vld [vmem:[%s1065_s28 + $0x1f] sm:$0x1]  ;;  %vm326_vm5 = vcmask 385344   ;;  %vm351_vm6 = vcmask 450944  }
  0x4b   : > { %vm376_vm7 = vcmask 516544   ;;  %v408_v34 = vld [vmem:[%s1065_s28 + $0x11] sm:$0x1]  ;;  %s559_s14 = scalar_lea.sflag [#allocation4], %s1061_s18 }
  0x4c   : > { %268 = vrot.lane.b32.xlu1 %v258_v9, %s934_s27  ;;  %266 = vrot.lane.b32.xlu0 %v257_v10, %s934_s27  ;;  %v536_v9 = vld [vmem:[%s1065_s28 + $0x17] sm:$0x1] }
  0x4d   : > { %270 = vrot.lane.b32.xlu2 %v259_v11, %s934_s27 }
  0x54   : > { %291 = vrot.lane.b32.xlu1 %v282_v12, %s935_s4  ;;  %289 = vrot.lane.b32.xlu0 %v281_v13, %s935_s4 }
  0x55   : > { %293 = vrot.lane.b32.xlu2 %v283_v14, %s935_s4 }
  0x5c   : > { %314 = vrot.lane.b32.xlu1 %v306_v15, %s936_s22  ;;  %295 = vrot.lane.b32.xlu0 %v284_v16, %s935_s4 }
  0x5d   : > { %316 = vrot.lane.b32.xlu2 %v307_v17, %s936_s22 }
  0x64   : > { %320 = vrot.lane.b32.xlu1 %v309_v18, %s936_s22  ;;  %318 = vrot.lane.b32.xlu0 %v308_v19, %s936_s22  ;;  %v407_v19 = vld [vmem:[%s1065_s28 + $0x9] sm:$0x1] }
  0x65   : > { %339 = vrot.lane.b32.xlu2 %v331_v20, %s937_s29 }
  0x6c   : > { %343 = vrot.lane.b32.xlu1 %v333_v21, %s937_s29  ;;  %341 = vrot.lane.b32.xlu0 %v332_v22, %s937_s29 }
  0x6d   : > { %345 = vrot.lane.b32.xlu2 %v334_v23, %s937_s29 }
  0x74   : > { %366 = vrot.lane.b32.xlu1 %v357_v24, %s938_s30  ;;  %364 = vrot.lane.b32.xlu0 %v356_v25, %s938_s30 }
  0x75   : > { %368 = vrot.lane.b32.xlu2 %v358_v26, %s938_s30 }
  0x7c   : > { %389 = vrot.lane.b32.xlu1 %v381_v27, %s939_s2  ;;  %370 = vrot.lane.b32.xlu0 %v359_v28, %s938_s30  ;;  %v406_v27 = vld [vmem:[%s1065_s28 + $0x1] sm:$0x1] }
  0x7d   : > { %391 = vrot.lane.b32.xlu2 %v382_v29, %s939_s2 }
  0x84   : > { %395 = vrot.lane.b32.xlu1 %v384_v30, %s939_s2  ;;  %393 = vrot.lane.b32.xlu0 %v383_v31, %s939_s2  ;;  %v409_v31 = vld [vmem:[%s1065_s28 + $0x19] sm:$0x1] }
  0x85   : > { %422 = vrot.lane.b32.xlu2 %v414_v32, %s932_s19 }
  0x8c   : > { %426 = vrot.lane.b32.xlu1 %v416_v35, %s932_s19  ;;  %424 = vrot.lane.b32.xlu0 %v415_v36, %s932_s19 }
  0x8d   : > { %428 = vrot.lane.b32.xlu2 %v417_v37, %s932_s19 }
  0x8f   : > { %v240_v42 = vpop.permute.xlu2 %239 }
  0x94   : > { %448 = vrot.lane.b32.xlu1 %v439_v40, %s933_s20  ;;  %446 = vrot.lane.b32.xlu0 %v438_v41, %s933_s20 }
  0x95   : > { %450 = vrot.lane.b32.xlu2 %v440_v43, %s933_s20 }
  0x97   : > { %v242_v46 = vpop.permute.xlu2 %241 }
  0x9c   : > { %470 = vrot.lane.b32.xlu1 %v462_v44, %s934_s27  ;;  %452 = vrot.lane.b32.xlu0 %v441_v45, %s933_s20 }
  0x9d   : > { %472 = vrot.lane.b32.xlu2 %v463_v47, %s934_s27 }
  0x9f   : > { %v265_v50 = vpop.permute.xlu2 %264 }
  0xa4   : > { %476 = vrot.lane.b32.xlu1 %v465_v48, %s934_s27  ;;  %474 = vrot.lane.b32.xlu0 %v464_v49, %s934_s27 }
  0xa5   : > { %494 = vrot.lane.b32.xlu2 %v486_v51, %s935_s4 }
  0xa6   : > { %v219_v52 = vpop.permute.xlu1 %218  ;;  %v215_v53 = vpop.permute.xlu0 %214 }
  0xa7   : > { %229 = vst.msk [vmem:[%s1131_s5 + $0x4] sm:$0x1] %vm226_vm1, %v219_v52  ;;  %v271_v56 = vpop.permute.xlu2 %270 }
  0xa8   : > { %227 = vst.msk [vmem:[%s1131_s5] sm:$0x1] %vm226_vm1, %v215_v53 }
  0xa9   : > { %252 = vst.msk [vmem:[%s1131_s5] sm:$0x1] %vm251_vm2, %v240_v42 }
  0xaa   : > { %277 = vst.msk [vmem:[%s1131_s5] sm:$0x1] %vm276_vm3, %v265_v50 }
  0xac   : > { %498 = vrot.lane.b32.xlu1 %v488_v54, %s935_s4  ;;  %496 = vrot.lane.b32.xlu0 %v487_v55, %s935_s4 }
  0xad   : > { %500 = vrot.lane.b32.xlu2 %v489_v57, %s935_s4 }
  0xae   : > { %v221_v58 = vpop.permute.xlu1 %220  ;;  %v217_v59 = vpop.permute.xlu0 %216 }
  0xaf   : > { %230 = vst.msk [vmem:[%s1131_s5 + $0x5] sm:$0x1] %vm226_vm1, %v221_v58  ;;  %v294_v62 = vpop.permute.xlu2 %293 }
  0xb0   : > { %228 = vst.msk [vmem:[%s1131_s5 + $0x1] sm:$0x1] %vm226_vm1, %v217_v59 }
  0xb1   : > { %253 = vst.msk [vmem:[%s1131_s5 + $0x1] sm:$0x1] %vm251_vm2, %v242_v46 }
  0xb4   : > { %520 = vrot.lane.b32.xlu1 %v511_v60, %s936_s22  ;;  %518 = vrot.lane.b32.xlu0 %v510_v61, %s936_s22 }
  0xb5   : > { %522 = vrot.lane.b32.xlu2 %v512_v63, %s936_s22 }
  0xb6   : > { %v246_v0 = vpop.permute.xlu1 %245  ;;  %v244_v1 = vpop.permute.xlu0 %243 }
  0xb7   : > { %255 = vst.msk [vmem:[%s1131_s5 + $0x5] sm:$0x1] %vm251_vm2, %v246_v0  ;;  %v317_v4 = vpop.permute.xlu2 %316 }
  0xb8   : > { %254 = vst.msk [vmem:[%s1131_s5 + $0x4] sm:$0x1] %vm251_vm2, %v244_v1 }
  0xb9   : > { %280 = vst.msk [vmem:[%s1131_s5 + $0x5] sm:$0x1] %vm276_vm3, %v271_v56 }
  0xbc   : > { %542 = vrot.lane.b32.xlu1 %v534_v2, %s937_s29  ;;  %524 = vrot.lane.b32.xlu0 %v513_v3, %s936_s22 }
  0xbd   : > { %544 = vrot.lane.b32.xlu2 %v535_v5, %s937_s29 }
  0xbe   : > { %v269_v6 = vpop.permute.xlu1 %268  ;;  %v267_v7 = vpop.permute.xlu0 %266 }
  0xbf   : > { %279 = vst.msk [vmem:[%s1131_s5 + $0x4] sm:$0x1] %vm276_vm3, %v269_v6  ;;  %v340_v10 = vpop.permute.xlu2 %339 }
  0xc0   : > { %278 = vst.msk [vmem:[%s1131_s5 + $0x1] sm:$0x1] %vm276_vm3, %v267_v7 }
  0xc1   : > { %304 = vst.msk [vmem:[%s1131_s5 + $0x4] sm:$0x1] %vm301_vm4, %v294_v62 }
  0xc4   : > { %548 = vrot.lane.b32.xlu1 %v537_v8, %s937_s29  ;;  %546 = vrot.lane.b32.xlu0 %v536_v9, %s937_s29 }
  0xc6   : > { %v292_v11 = vpop.permute.xlu1 %291  ;;  %v290_v12 = vpop.permute.xlu0 %289 }
  0xc7   : > { %303 = vst.msk [vmem:[%s1131_s5 + $0x1] sm:$0x1] %vm301_vm4, %v292_v11  ;;  %v346_v13 = vpop.permute.xlu2 %345 }
  0xc8   : > { %302 = vst.msk [vmem:[%s1131_s5] sm:$0x1] %vm301_vm4, %v290_v12 }
  0xc9   : > { %328 = vst.msk [vmem:[%s1131_s5 + $0x1] sm:$0x1] %vm326_vm5, %v317_v4 }
  0xce   : > { %v315_v14 = vpop.permute.xlu1 %314  ;;  %v296_v15 = vpop.permute.xlu0 %295 }
  0xcf   : > { %327 = vst.msk [vmem:[%s1131_s5] sm:$0x1] %vm326_vm5, %v315_v14  ;;  %v369_v16 = vpop.permute.xlu2 %368 }
  0xd0   : > { %305 = vst.msk [vmem:[%s1131_s5 + $0x5] sm:$0x1] %vm301_vm4, %v296_v15 }
  0xd1   : > { %352 = vst.msk [vmem:[%s1131_s5] sm:$0x1] %vm351_vm6, %v340_v10 }
  0xd6   : > { %v321_v17 = vpop.permute.xlu1 %320  ;;  %v319_v18 = vpop.permute.xlu0 %318 }
  0xd7   : > { %330 = vst.msk [vmem:[%s1131_s5 + $0x5] sm:$0x1] %vm326_vm5, %v321_v17  ;;  %v392_v20 = vpop.permute.xlu2 %391 }
  0xd8   : > { %329 = vst.msk [vmem:[%s1131_s5 + $0x4] sm:$0x1] %vm326_vm5, %v319_v18 }
  0xd9   : > { %355 = vst.msk [vmem:[%s1131_s5 + $0x5] sm:$0x1] %vm351_vm6, %v346_v13 }
  0xda   : > { %710 = vst.msk [vmem:[%s1131_s5 + $0x3] sm:$0x1] %vm201_vm0, %v392_v20 }
  0xdb   : > { %714 = vst.msk [vmem:[%s1131_s5 + $0x3] sm:$0x1] %vm226_vm1, %v407_v19 }
  0xde   : > { %v344_v21 = vpop.permute.xlu1 %343  ;;  %v342_v22 = vpop.permute.xlu0 %341 }
  0xdf   : > { %354 = vst.msk [vmem:[%s1131_s5 + $0x4] sm:$0x1] %vm351_vm6, %v344_v21  ;;  %v423_v23 = vpop.permute.xlu2 %422 }
  0xe0   : > { %353 = vst.msk [vmem:[%s1131_s5 + $0x1] sm:$0x1] %vm351_vm6, %v342_v22 }
  0xe1   : > { %379 = vst.msk [vmem:[%s1131_s5 + $0x4] sm:$0x1] %vm376_vm7, %v369_v16 }
  0xe6   : > { %v367_v24 = vpop.permute.xlu1 %366  ;;  %v365_v25 = vpop.permute.xlu0 %364 }
  0xe7   : > { %378 = vst.msk [vmem:[%s1131_s5 + $0x1] sm:$0x1] %vm376_vm7, %v367_v24  ;;  %v429_v26 = vpop.permute.xlu2 %428 }
  0xe8   : > { %377 = vst.msk [vmem:[%s1131_s5] sm:$0x1] %vm376_vm7, %v365_v25 }
  0xee   : > { %v390_v28 = vpop.permute.xlu1 %389  ;;  %v371_v29 = vpop.permute.xlu0 %370 }
  0xef   : > { %709 = vst.msk [vmem:[%s1131_s5 + $0x2] sm:$0x1] %vm201_vm0, %v390_v28  ;;  %v451_v30 = vpop.permute.xlu2 %450 }
  0xf0   : > { %713 = vst.msk [vmem:[%s1131_s5 + $0x2] sm:$0x1] %vm226_vm1, %v406_v27 }
  0xf1   : > { %380 = vst.msk [vmem:[%s1131_s5 + $0x5] sm:$0x1] %vm376_vm7, %v371_v29 }
  0xf2   : > { %717 = vst.msk [vmem:[%s1131_s5 + $0x2] sm:$0x1] %vm251_vm2, %v423_v23 }
  0xf6   : > { %v396_v32 = vpop.permute.xlu1 %395  ;;  %v394_v33 = vpop.permute.xlu0 %393 }
  0xf7   : > { %712 = vst.msk [vmem:[%s1131_s5 + $0x7] sm:$0x1] %vm201_vm0, %v396_v32  ;;  %v473_v35 = vpop.permute.xlu2 %472 }
  0xf8   : > { %716 = vst.msk [vmem:[%s1131_s5 + $0x7] sm:$0x1] %vm226_vm1, %v409_v31 }
  0xf9   : > { %711 = vst.msk [vmem:[%s1131_s5 + $0x6] sm:$0x1] %vm201_vm0, %v394_v33 }
  0xfa   : > { %715 = vst.msk [vmem:[%s1131_s5 + $0x6] sm:$0x1] %vm226_vm1, %v408_v34 }
  0xfb   : > { %720 = vst.msk [vmem:[%s1131_s5 + $0x7] sm:$0x1] %vm251_vm2, %v429_v26 }
  0xfe   : > { %v427_v36 = vpop.permute.xlu1 %426  ;;  %v425_v37 = vpop.permute.xlu0 %424 }
  0xff   : > { %719 = vst.msk [vmem:[%s1131_s5 + $0x6] sm:$0x1] %vm251_vm2, %v427_v36  ;;  %v495_v40 = vpop.permute.xlu2 %494 }
 0x100   : > { %718 = vst.msk [vmem:[%s1131_s5 + $0x3] sm:$0x1] %vm251_vm2, %v425_v37 }
 0x101   : > { %723 = vst.msk [vmem:[%s1131_s5 + $0x6] sm:$0x1] %vm276_vm3, %v451_v30 }
 0x106   : > { %v449_v38 = vpop.permute.xlu1 %448  ;;  %v447_v39 = vpop.permute.xlu0 %446 }
 0x107   : > { %722 = vst.msk [vmem:[%s1131_s5 + $0x3] sm:$0x1] %vm276_vm3, %v449_v38  ;;  %v501_v43 = vpop.permute.xlu2 %500 }
 0x108   : > { %721 = vst.msk [vmem:[%s1131_s5 + $0x2] sm:$0x1] %vm276_vm3, %v447_v39 }
 0x109   : > { %726 = vst.msk [vmem:[%s1131_s5 + $0x3] sm:$0x1] %vm301_vm4, %v473_v35 }
 0x10e   : > { %v471_v41 = vpop.permute.xlu1 %470  ;;  %v453_v42 = vpop.permute.xlu0 %452 }
 0x10f   : > { %725 = vst.msk [vmem:[%s1131_s5 + $0x2] sm:$0x1] %vm301_vm4, %v471_v41  ;;  %v523_v46 = vpop.permute.xlu2 %522 }
 0x110   : > { %724 = vst.msk [vmem:[%s1131_s5 + $0x7] sm:$0x1] %vm276_vm3, %v453_v42 }
 0x111   : > { %729 = vst.msk [vmem:[%s1131_s5 + $0x2] sm:$0x1] %vm326_vm5, %v495_v40 }
 0x116   : > { %v477_v44 = vpop.permute.xlu1 %476  ;;  %v475_v45 = vpop.permute.xlu0 %474 }
 0x117   : > { %728 = vst.msk [vmem:[%s1131_s5 + $0x7] sm:$0x1] %vm301_vm4, %v477_v44  ;;  %v545_v49 = vpop.permute.xlu2 %544 }
 0x118   : > { %727 = vst.msk [vmem:[%s1131_s5 + $0x6] sm:$0x1] %vm301_vm4, %v475_v45 }
 0x119   : > { %732 = vst.msk [vmem:[%s1131_s5 + $0x7] sm:$0x1] %vm326_vm5, %v501_v43 }
 0x11e   : > { %v499_v47 = vpop.permute.xlu1 %498  ;;  %v497_v48 = vpop.permute.xlu0 %496 }
 0x11f   : > { %731 = vst.msk [vmem:[%s1131_s5 + $0x6] sm:$0x1] %vm326_vm5, %v499_v47 }
 0x120   : > { %730 = vst.msk [vmem:[%s1131_s5 + $0x3] sm:$0x1] %vm326_vm5, %v497_v48 }
 0x121   : > { %735 = vst.msk [vmem:[%s1131_s5 + $0x6] sm:$0x1] %vm351_vm6, %v523_v46 }
 0x126   : > { %v521_v50 = vpop.permute.xlu1 %520  ;;  %v519_v51 = vpop.permute.xlu0 %518 }
 0x127   : > { %734 = vst.msk [vmem:[%s1131_s5 + $0x3] sm:$0x1] %vm351_vm6, %v521_v50 }
 0x128   : > { %733 = vst.msk [vmem:[%s1131_s5 + $0x2] sm:$0x1] %vm351_vm6, %v519_v51 }
 0x129   : > { %738 = vst.msk [vmem:[%s1131_s5 + $0x3] sm:$0x1] %vm376_vm7, %v545_v49 }
 0x12e   : > { %v543_v52 = vpop.permute.xlu1 %542  ;;  %v525_v53 = vpop.permute.xlu0 %524 }
 0x12f   : > { %737 = vst.msk [vmem:[%s1131_s5 + $0x2] sm:$0x1] %vm376_vm7, %v543_v52 }
 0x130   : > { %736 = vst.msk [vmem:[%s1131_s5 + $0x7] sm:$0x1] %vm351_vm6, %v525_v53 }
 0x136   : > { %v549_v54 = vpop.permute.xlu1 %548  ;;  %v547_v55 = vpop.permute.xlu0 %546 }
 0x137   : > { %740 = vst.msk [vmem:[%s1131_s5 + $0x7] sm:$0x1] %vm376_vm7, %v549_v54 }
 0x138   : > { %739 = vst.msk [vmem:[%s1131_s5 + $0x6] sm:$0x1] %vm376_vm7, %v547_v55 }
 0x139   : > { %s742_s15 = sshll.u32 %s908_s9, 2  ;;  %s743_s23 = sshll.u32 %s912_s10, 3 }
 0x13a   : > { %s571_s24 = sadd.s32 %s743_s23, %s742_s15  ;;  %s585_s28 = sshll.u32 %s1131_s5, 4  ;;  %s586_s28 = int_to_ptr.vmem [resolvable:$true] %s585_s28 }
 0x13b   : > { %s574_s27 = scalar_lea.hbm %s1364_s1, %s571_s24  ;;  %s940_s4 = smov 64  }
 0x13c   : > { %s587_s18 = sshll.u32 %s574_s27, 4  ;;  %756 = sst [smem:[#allocation9]] (%p1021_p9), %s940_s4  ;;  %s588_s18 = int_to_ptr.hbm [resolvable:$true] %s587_s18 }
 0x13d   : > { %s941_s22 = smov 256   ;;  %s942_s9 = smov 4  }
 0x13e   : > { %757 = sst [smem:[#allocation9 + $0x1]] (%p1021_p9), %s941_s22  ;;  %s943_s10 = smov 16  }
 0x13f   : > { %758 = sst [smem:[#allocation9 + $0x2]] (%p1021_p9), %s942_s9  ;;  %s944_s29 = smov 1  }
 0x140   : > { %759 = sst [smem:[#allocation9 + $0x3]] (%p1021_p9), %s943_s10  ;;  %s945_s30 = smov [#allocation8]  }
 0x141   : > { %760 = sst [smem:[#allocation9 + $0x4]] (%p1021_p9), %s943_s10  ;;  %s946_s2 = smov 0  }
 0x142   : > { %761 = sst [smem:[#allocation9 + $0x5]] (%p1021_p9), %s944_s29 }
 0x143   : > { %762 = dma.general (%p1021_p9), %s586_s28, 128, %s588_s18, %s559_s14, %s945_s30, [#allocation9], %s946_s2, 0  }
 0x144 PF: > { %p768_p3 = scmp.ge.s32.totalorder %s924_s13, 2  ;;  %s615_s3 = sand.u32 1, %s896_s6  }
 0x145   : > { %s616_s5 = scalar_lea.sflag [#allocation4], %s615_s3 }
 0x146   : > { %p765_p4 = pnand %p768_p3, %p1028_p12 }
 0x148   : > { %p766_p5 = pneg %p765_p4 }
 0x14a   : > { %891 = dma.done.wait (%p766_p5), %s616_s5, 128  }
 0x14b   : > { %893 = vsyncadd (%p766_p5), %s616_s5, 4294967168  ;;  %s17_s13 = sadd.s32 1, %s924_s13   ;;  %s1369_s6 = smov %s900_s7 }
 0x14c   : > { %p14_p6 = scmp.ge.s32.totalorder %s17_s13, 6   ;;  %s1370_s7 = smov %s904_s8 }
 0x14d   : > { %s1371_s8 = smov %s1033_s26  ;;  %s1372_s9 = smov %s916_s11 }
 0x14e   : > { %s1373_s10 = smov %s920_s12  ;;  %s1374_s11 = smov %s1377_s16 }
 0x14f   : > { %s1375_s12 = smov %s1381_s17  ;;  %16 = sbr.rel (!%p14_p6) target bundleno = 7 (0x7), region = 80 }
 0x154   :  { %622 = vsyncpa [#allocation3], 1 }
 0x155   :  { %624 = vsyncpa [#allocation3 + $0x1], 1 }
 0x156   :  { %625 = vsyncpa [#allocation4], 1 }
 0x157   :  { %627 = vsyncpa [#allocation4 + $0x1], 1 }

</bundles_post_ra>
